<compile_context>
chip_gen: v6e
topology: v6e:2x2x1
jax: 0.10.0
libtpu: 0.0.40
codegen_flags: <defaults>
</compile_context>

<pallas_src>
import jax
import jax.numpy as jnp
from jax.experimental import pallas as pl
from jax.experimental.pallas import tpu as pltpu

# MyModel layer dims: 20 -> 24 -> 40 -> 60 -> 40 -> 20 -> 5 -> 1
DIMS = [20, 24, 40, 60, 40, 20, 5, 1]
ACTS = ("relu", "relu", "relu", "sigmoid", "relu", "relu", "sigmoid")
PAD = 128            # pad every feature dim to one lane width (free in vreg layout)
TB_MAX = 2048        # max batch rows per grid step
MIN_GRID_STEPS = 8   # aim for >= 8 steps so both v7x TCs stay busy and pipelined


def _cdiv(a, m):
    return (a + m - 1) // m


def _round_up(a, m):
    return _cdiv(a, m) * m


def _mlp_kernel(x_ref, w1_ref, wr_ref, w7_ref, b_ref, o_ref):
    """One batch tile of the 7-layer MLP.

    x_ref : (TB, 20)       bf16  streamed per grid step
    w1_ref: (20, 128)      bf16  layer-1 weight (VMEM-resident)
    wr_ref: (5, 128, 128)  bf16  layers 2..6, zero-padded (VMEM-resident)
    w7_ref: (1, 128)       f32   layer-7 weight row, zero-padded (resident)
    b_ref : (7, 1, 128)    f32   biases, zero-padded (VMEM-resident)
    o_ref : (TB, 1)        f32
    """
    f32 = jnp.float32
    bf16 = jnp.bfloat16

    # layer 1: 20 -> 24 (padded to 128 lanes), relu
    acc = jnp.dot(x_ref[...], w1_ref[...], preferred_element_type=f32) + b_ref[0]
    h = jax.nn.relu(acc).astype(bf16)                         # (TB, 128)

    # layers 2..6: uniform padded (128 -> 128) MXU matmuls. Zero-padded weight
    # rows keep the dead lanes inert (they kill the sigmoid(0)=0.5 columns
    # produced by the padded lanes of layer 4; layer-6 dead lanes are exact 0).
    for li, act in enumerate(ACTS[1:6]):                      # 5 MXU layers
        acc = jnp.dot(h, wr_ref[li], preferred_element_type=f32) + b_ref[li + 1]
        acc = jax.nn.relu(acc) if act == "relu" else jax.nn.sigmoid(acc)
        # layers 2..5 feed another MXU matmul -> bf16; layer-6 output stays f32
        # since it only feeds the VPU/XLU epilogue below.
        h = acc.astype(bf16) if li < 4 else acc               # (TB, 128)

    # layer 7: 5 -> 1, sigmoid, off the MXU. VPU broadcast-multiply + XLU lane
    # reduce; padded lanes are 0 * 0 so they contribute exactly nothing.
    s = jnp.sum(h * w7_ref[...], axis=-1, keepdims=True)      # (TB, 1) f32
    b7 = b_ref[6][:, :1]                                      # (1, 1)
    o_ref[...] = jax.nn.sigmoid(s + b7)


def pack_params(params):
    """Pad/concatenate the 7 (W, b) pairs into four resident, lane-aligned slabs."""
    assert len(params) == len(DIMS) - 1
    w1 = jnp.zeros((DIMS[0], PAD), jnp.bfloat16)
    w1 = w1.at[:, : DIMS[1]].set(params[0][0].astype(jnp.bfloat16))

    w_rest = jnp.zeros((5, PAD, PAD), jnp.bfloat16)           # layers 2..6
    for i, (w, _) in enumerate(params[1:6]):
        w_rest = w_rest.at[i, : w.shape[0], : w.shape[1]].set(w.astype(jnp.bfloat16))

    w7_row = jnp.zeros((1, PAD), jnp.float32)                 # layer 7 as a row
    w7_row = w7_row.at[0, : DIMS[6]].set(
        params[6][0].reshape(-1).astype(jnp.float32))

    b_pack = jnp.zeros((len(params), 1, PAD), jnp.float32)
    for i, (_, b) in enumerate(params):
        b_pack = b_pack.at[i, 0, : b.shape[-1]].set(b.reshape(-1).astype(jnp.float32))
    return w1, w_rest, w7_row, b_pack


def mlp_forward(x, w1, w_rest, w7_row, b_pack):
    """x: (B, 20) float32 -> (B, 1) float32."""
    B, d_in = x.shape
    assert d_in == DIMS[0]

    # Tile choice: keep the grid >= MIN_GRID_STEPS when B allows it (v7x has
    # 2 TCs sharding the "parallel" axis), rows per step a multiple of 16
    # (bf16 sublane pack), capped at TB_MAX for VMEM headroom.
    tb = min(TB_MAX, max(16, _round_up(_cdiv(B, MIN_GRID_STEPS), 16)))
    b_pad = _round_up(B, tb)
    grid = b_pad // tb

    x_bf = x.astype(jnp.bfloat16)
    if b_pad != B:
        x_bf = jnp.pad(x_bf, ((0, b_pad - B), (0, 0)))

    out = pl.pallas_call(
        _mlp_kernel,
        out_shape=jax.ShapeDtypeStruct((b_pad, 1), jnp.float32),
        grid_spec=pltpu.PrefetchScalarGridSpec(
            num_scalar_prefetch=0,
            grid=(grid,),
            in_specs=[
                pl.BlockSpec((tb, d_in), lambda i: (i, 0)),        # streamed
                pl.BlockSpec(w1.shape, lambda i: (0, 0)),          # resident
                pl.BlockSpec(w_rest.shape, lambda i: (0, 0, 0)),   # resident
                pl.BlockSpec(w7_row.shape, lambda i: (0, 0)),      # resident
                pl.BlockSpec(b_pack.shape, lambda i: (0, 0, 0)),   # resident
            ],
            out_specs=pl.BlockSpec((tb, 1), lambda i: (i, 0)),
        ),
        compiler_params=pltpu.CompilerParams(
            dimension_semantics=("parallel",),     # shard batch across TCs (v7x)
            vmem_limit_bytes=32 * 1024 * 1024,
        ),
    )(x_bf, w1, w_rest, w7_row, b_pack)
    return out[:B]


def init_params(key):
    """Deterministic init mirroring torch.nn.Linear default (uniform ±1/sqrt(fan_in))."""
    params = []
    for i in range(len(DIMS) - 1):
        fan_in, fan_out = DIMS[i], DIMS[i + 1]
        key, kw, kb = jax.random.split(key, 3)
        bound = 1.0 / jnp.sqrt(fan_in)
        w = jax.random.uniform(kw, (fan_in, fan_out), jnp.float32, -bound, bound)
        b = jax.random.uniform(kb, (1, fan_out), jnp.float32, -bound, bound)
        params.append((w, b))
    return params


def reference_forward(x, params):
    """Pure-JAX reference mirroring the kernel numerics (bf16 MXU operands,
    f32 accumulate, f32 activations, f32 layer-7 epilogue)."""
    h = x.astype(jnp.bfloat16)
    for i in range(6):
        w, b = params[i]
        acc = jnp.dot(h, w.astype(jnp.bfloat16),
                      preferred_element_type=jnp.float32) + b
        acc = jax.nn.relu(acc) if ACTS[i] == "relu" else jax.nn.sigmoid(acc)
        h = acc.astype(jnp.bfloat16) if i < 5 else acc
    w7, b7 = params[6]
    return jax.nn.sigmoid(jnp.dot(h, w7) + b7)


if __name__ == "__main__":
    key = jax.random.PRNGKey(0)
    key, kx = jax.random.split(key)
    B = 100                                   # small; exercises a multi-step grid + padded tail
    x = jax.random.normal(kx, (B, DIMS[0]), jnp.float32)
    params = init_params(key)
    w1, w_rest, w7_row, b_pack = pack_params(params)

    out = mlp_forward(x, w1, w_rest, w7_row, b_pack)
    out = jax.block_until_ready(out)

    ref = reference_forward(x, params)
    assert out.shape == (B, 1)
    assert jnp.allclose(out, ref, atol=1e-4, rtol=1e-4), \
        float(jnp.max(jnp.abs(out - ref)))
    print("KERNEL_OK")
</pallas_src>

<mosaic_0001>
module attributes {stable_mosaic.version = 11 : i64} {
  func.func @_mlp_kernel(%arg0: i32, %arg1: memref<16x20xbf16, #tpu.memory_space<vmem>>, %arg2: memref<20x128xbf16, #tpu.memory_space<vmem>>, %arg3: memref<5x128x128xbf16, #tpu.memory_space<vmem>>, %arg4: memref<1x128xf32, #tpu.memory_space<vmem>>, %arg5: memref<7x1x128xf32, #tpu.memory_space<vmem>>, %arg6: memref<16x1xf32, #tpu.memory_space<vmem>>) attributes {dimension_semantics = [#tpu.dimension_semantics<parallel>], iteration_bounds = array<i64: 7>, scalar_prefetch = 0 : i64, scratch_operands = 0 : i64, tpu.core_type = #tpu.core_type<tc>, window_params = [{transform_indices = @transform_0, window_bounds = array<i64: 16, 20>}, {pipeline_mode = #tpu.pipeline_mode<synchronous>, transform_indices = @transform_1, window_bounds = array<i64: 20, 128>}, {pipeline_mode = #tpu.pipeline_mode<synchronous>, transform_indices = @transform_2, window_bounds = array<i64: 5, 128, 128>}, {pipeline_mode = #tpu.pipeline_mode<synchronous>, transform_indices = @transform_3, window_bounds = array<i64: 1, 128>}, {pipeline_mode = #tpu.pipeline_mode<synchronous>, transform_indices = @transform_4, window_bounds = array<i64: 7, 1, 128>}, {transform_indices = @transform_5, window_bounds = array<i64: 16, 1>}]} {
    %c0 = arith.constant 0 : index
    %c0_0 = arith.constant 0 : index
    %0 = vector.load %arg1[%c0, %c0_0] : memref<16x20xbf16, #tpu.memory_space<vmem>>, vector<16x20xbf16>
    %c0_1 = arith.constant 0 : index
    %c0_2 = arith.constant 0 : index
    %1 = vector.load %arg2[%c0_1, %c0_2] : memref<20x128xbf16, #tpu.memory_space<vmem>>, vector<20x128xbf16>
    %cst = arith.constant dense<0.000000e+00> : vector<16x128xf32>
    %2 = tpu.matmul %0, %1, %cst {dimension_numbers = #tpu.dot_dimension_numbers<[1], [0], [0], [1], [0, 0, 1, 1], [], []>} : vector<16x20xbf16>, vector<20x128xbf16>, vector<16x128xf32> -> vector<16x128xf32>
    %c0_3 = arith.constant 0 : index
    %c0_4 = arith.constant 0 : index
    %c0_5 = arith.constant 0 : index
    %3 = vector.load %arg5[%c0_3, %c0_4, %c0_5] : memref<7x1x128xf32, #tpu.memory_space<vmem>>, vector<1x1x128xf32>
    %4 = vector.shape_cast %3 : vector<1x1x128xf32> to vector<1x128xf32>
    %5 = vector.broadcast %4 : vector<1x128xf32> to vector<16x128xf32>
    %6 = arith.addf %2, %5 : vector<16x128xf32>
    %cst_6 = arith.constant 0.000000e+00 : f32
    %7 = vector.broadcast %cst_6 : f32 to vector<16x128xf32>
    %8 = arith.maximumf %6, %7 : vector<16x128xf32>
    %9 = arith.truncf %8 : vector<16x128xf32> to vector<16x128xbf16>
    %c0_7 = arith.constant 0 : index
    %c0_8 = arith.constant 0 : index
    %c0_9 = arith.constant 0 : index
    %10 = vector.load %arg3[%c0_7, %c0_8, %c0_9] : memref<5x128x128xbf16, #tpu.memory_space<vmem>>, vector<1x128x128xbf16>
    %11 = vector.shape_cast %10 : vector<1x128x128xbf16> to vector<128x128xbf16>
    %cst_10 = arith.constant dense<0.000000e+00> : vector<16x128xf32>
    %12 = tpu.matmul %9, %11, %cst_10 {dimension_numbers = #tpu.dot_dimension_numbers<[1], [0], [0], [1], [0, 0, 1, 1], [], []>} : vector<16x128xbf16>, vector<128x128xbf16>, vector<16x128xf32> -> vector<16x128xf32>
    %c1 = arith.constant 1 : index
    %c0_11 = arith.constant 0 : index
    %c0_12 = arith.constant 0 : index
    %13 = vector.load %arg5[%c1, %c0_11, %c0_12] : memref<7x1x128xf32, #tpu.memory_space<vmem>>, vector<1x1x128xf32>
    %14 = vector.shape_cast %13 : vector<1x1x128xf32> to vector<1x128xf32>
    %15 = vector.broadcast %14 : vector<1x128xf32> to vector<16x128xf32>
    %16 = arith.addf %12, %15 : vector<16x128xf32>
    %cst_13 = arith.constant 0.000000e+00 : f32
    %17 = vector.broadcast %cst_13 : f32 to vector<16x128xf32>
    %18 = arith.maximumf %16, %17 : vector<16x128xf32>
    %19 = arith.truncf %18 : vector<16x128xf32> to vector<16x128xbf16>
    %c1_14 = arith.constant 1 : index
    %c0_15 = arith.constant 0 : index
    %c0_16 = arith.constant 0 : index
    %20 = vector.load %arg3[%c1_14, %c0_15, %c0_16] : memref<5x128x128xbf16, #tpu.memory_space<vmem>>, vector<1x128x128xbf16>
    %21 = vector.shape_cast %20 : vector<1x128x128xbf16> to vector<128x128xbf16>
    %cst_17 = arith.constant dense<0.000000e+00> : vector<16x128xf32>
    %22 = tpu.matmul %19, %21, %cst_17 {dimension_numbers = #tpu.dot_dimension_numbers<[1], [0], [0], [1], [0, 0, 1, 1], [], []>} : vector<16x128xbf16>, vector<128x128xbf16>, vector<16x128xf32> -> vector<16x128xf32>
    %c2 = arith.constant 2 : index
    %c0_18 = arith.constant 0 : index
    %c0_19 = arith.constant 0 : index
    %23 = vector.load %arg5[%c2, %c0_18, %c0_19] : memref<7x1x128xf32, #tpu.memory_space<vmem>>, vector<1x1x128xf32>
    %24 = vector.shape_cast %23 : vector<1x1x128xf32> to vector<1x128xf32>
    %25 = vector.broadcast %24 : vector<1x128xf32> to vector<16x128xf32>
    %26 = arith.addf %22, %25 : vector<16x128xf32>
    %cst_20 = arith.constant 0.000000e+00 : f32
    %27 = vector.broadcast %cst_20 : f32 to vector<16x128xf32>
    %28 = arith.maximumf %26, %27 : vector<16x128xf32>
    %29 = arith.truncf %28 : vector<16x128xf32> to vector<16x128xbf16>
    %c2_21 = arith.constant 2 : index
    %c0_22 = arith.constant 0 : index
    %c0_23 = arith.constant 0 : index
    %30 = vector.load %arg3[%c2_21, %c0_22, %c0_23] : memref<5x128x128xbf16, #tpu.memory_space<vmem>>, vector<1x128x128xbf16>
    %31 = vector.shape_cast %30 : vector<1x128x128xbf16> to vector<128x128xbf16>
    %cst_24 = arith.constant dense<0.000000e+00> : vector<16x128xf32>
    %32 = tpu.matmul %29, %31, %cst_24 {dimension_numbers = #tpu.dot_dimension_numbers<[1], [0], [0], [1], [0, 0, 1, 1], [], []>} : vector<16x128xbf16>, vector<128x128xbf16>, vector<16x128xf32> -> vector<16x128xf32>
    %c3 = arith.constant 3 : index
    %c0_25 = arith.constant 0 : index
    %c0_26 = arith.constant 0 : index
    %33 = vector.load %arg5[%c3, %c0_25, %c0_26] : memref<7x1x128xf32, #tpu.memory_space<vmem>>, vector<1x1x128xf32>
    %34 = vector.shape_cast %33 : vector<1x1x128xf32> to vector<1x128xf32>
    %35 = vector.broadcast %34 : vector<1x128xf32> to vector<16x128xf32>
    %36 = arith.addf %32, %35 : vector<16x128xf32>
    %37 = arith.negf %36 : vector<16x128xf32>
    %38 = math.exp %37 : vector<16x128xf32>
    %cst_27 = arith.constant 1.000000e+00 : f32
    %39 = vector.broadcast %cst_27 : f32 to vector<16x128xf32>
    %40 = arith.addf %39, %38 : vector<16x128xf32>
    %41 = arith.divf %39, %40 : vector<16x128xf32>
    %42 = arith.truncf %41 : vector<16x128xf32> to vector<16x128xbf16>
    %c3_28 = arith.constant 3 : index
    %c0_29 = arith.constant 0 : index
    %c0_30 = arith.constant 0 : index
    %43 = vector.load %arg3[%c3_28, %c0_29, %c0_30] : memref<5x128x128xbf16, #tpu.memory_space<vmem>>, vector<1x128x128xbf16>
    %44 = vector.shape_cast %43 : vector<1x128x128xbf16> to vector<128x128xbf16>
    %cst_31 = arith.constant dense<0.000000e+00> : vector<16x128xf32>
    %45 = tpu.matmul %42, %44, %cst_31 {dimension_numbers = #tpu.dot_dimension_numbers<[1], [0], [0], [1], [0, 0, 1, 1], [], []>} : vector<16x128xbf16>, vector<128x128xbf16>, vector<16x128xf32> -> vector<16x128xf32>
    %c4 = arith.constant 4 : index
    %c0_32 = arith.constant 0 : index
    %c0_33 = arith.constant 0 : index
    %46 = vector.load %arg5[%c4, %c0_32, %c0_33] : memref<7x1x128xf32, #tpu.memory_space<vmem>>, vector<1x1x128xf32>
    %47 = vector.shape_cast %46 : vector<1x1x128xf32> to vector<1x128xf32>
    %48 = vector.broadcast %47 : vector<1x128xf32> to vector<16x128xf32>
    %49 = arith.addf %45, %48 : vector<16x128xf32>
    %cst_34 = arith.constant 0.000000e+00 : f32
    %50 = vector.broadcast %cst_34 : f32 to vector<16x128xf32>
    %51 = arith.maximumf %49, %50 : vector<16x128xf32>
    %52 = arith.truncf %51 : vector<16x128xf32> to vector<16x128xbf16>
    %c4_35 = arith.constant 4 : index
    %c0_36 = arith.constant 0 : index
    %c0_37 = arith.constant 0 : index
    %53 = vector.load %arg3[%c4_35, %c0_36, %c0_37] : memref<5x128x128xbf16, #tpu.memory_space<vmem>>, vector<1x128x128xbf16>
    %54 = vector.shape_cast %53 : vector<1x128x128xbf16> to vector<128x128xbf16>
    %cst_38 = arith.constant dense<0.000000e+00> : vector<16x128xf32>
    %55 = tpu.matmul %52, %54, %cst_38 {dimension_numbers = #tpu.dot_dimension_numbers<[1], [0], [0], [1], [0, 0, 1, 1], [], []>} : vector<16x128xbf16>, vector<128x128xbf16>, vector<16x128xf32> -> vector<16x128xf32>
    %c5 = arith.constant 5 : index
    %c0_39 = arith.constant 0 : index
    %c0_40 = arith.constant 0 : index
    %56 = vector.load %arg5[%c5, %c0_39, %c0_40] : memref<7x1x128xf32, #tpu.memory_space<vmem>>, vector<1x1x128xf32>
    %57 = vector.shape_cast %56 : vector<1x1x128xf32> to vector<1x128xf32>
    %58 = vector.broadcast %57 : vector<1x128xf32> to vector<16x128xf32>
    %59 = arith.addf %55, %58 : vector<16x128xf32>
    %cst_41 = arith.constant 0.000000e+00 : f32
    %60 = vector.broadcast %cst_41 : f32 to vector<16x128xf32>
    %61 = arith.maximumf %59, %60 : vector<16x128xf32>
    %c0_42 = arith.constant 0 : index
    %c0_43 = arith.constant 0 : index
    %62 = vector.load %arg4[%c0_42, %c0_43] : memref<1x128xf32, #tpu.memory_space<vmem>>, vector<1x128xf32>
    %63 = vector.broadcast %62 : vector<1x128xf32> to vector<16x128xf32>
    %64 = arith.mulf %61, %63 : vector<16x128xf32>
    %cst_44 = arith.constant dense<0.000000e+00> : vector<16xf32>
    %65 = vector.multi_reduction <add>, %64, %cst_44 [1] : vector<16x128xf32> to vector<16xf32>
    %66 = vector.shape_cast %65 : vector<16xf32> to vector<16x1xf32>
    %c6 = arith.constant 6 : index
    %c0_45 = arith.constant 0 : index
    %c0_46 = arith.constant 0 : index
    %67 = vector.load %arg5[%c6, %c0_45, %c0_46] : memref<7x1x128xf32, #tpu.memory_space<vmem>>, vector<1x1x128xf32>
    %68 = vector.shape_cast %67 : vector<1x1x128xf32> to vector<1x128xf32>
    %69 = vector.extract_strided_slice %68 {offsets = [0, 0], sizes = [1, 1], strides = [1, 1]} : vector<1x128xf32> to vector<1x1xf32>
    %70 = vector.broadcast %69 : vector<1x1xf32> to vector<16x1xf32>
    %71 = arith.addf %66, %70 : vector<16x1xf32>
    %72 = arith.negf %71 : vector<16x1xf32>
    %73 = math.exp %72 : vector<16x1xf32>
    %cst_47 = arith.constant 1.000000e+00 : f32
    %74 = vector.broadcast %cst_47 : f32 to vector<16x1xf32>
    %75 = arith.addf %74, %73 : vector<16x1xf32>
    %76 = arith.divf %74, %75 : vector<16x1xf32>
    %c0_48 = arith.constant 0 : index
    %c0_49 = arith.constant 0 : index
    %77 = vector.load %arg6[%c0_48, %c0_49] : memref<16x1xf32, #tpu.memory_space<vmem>>, vector<16x1xf32>
    tpu.vector_store %arg6[%c0_48, %c0_49], %76 {strides = array<i32>} : memref<16x1xf32, #tpu.memory_space<vmem>>, vector<16x1xf32>,
    return
  }
  func.func @transform_0(%arg0: i32) -> (i32, i32) {
    %c0_i32 = arith.constant 0 : i32
    %c0_i32_0 = arith.constant 0 : i32
    return %arg0, %c0_i32 : i32, i32
  }
  func.func @transform_1(%arg0: i32) -> (i32, i32) {
    %c0_i32 = arith.constant 0 : i32
    %c0_i32_0 = arith.constant 0 : i32
    %c0_i32_1 = arith.constant 0 : i32
    return %c0_i32, %c0_i32_0 : i32, i32
  }
  func.func @transform_2(%arg0: i32) -> (i32, i32, i32) {
    %c0_i32 = arith.constant 0 : i32
    %c0_i32_0 = arith.constant 0 : i32
    %c0_i32_1 = arith.constant 0 : i32
    %c0_i32_2 = arith.constant 0 : i32
    return %c0_i32, %c0_i32_0, %c0_i32_1 : i32, i32, i32
  }
  func.func @transform_3(%arg0: i32) -> (i32, i32) {
    %c0_i32 = arith.constant 0 : i32
    %c0_i32_0 = arith.constant 0 : i32
    %c0_i32_1 = arith.constant 0 : i32
    return %c0_i32, %c0_i32_0 : i32, i32
  }
  func.func @transform_4(%arg0: i32) -> (i32, i32, i32) {
    %c0_i32 = arith.constant 0 : i32
    %c0_i32_0 = arith.constant 0 : i32
    %c0_i32_1 = arith.constant 0 : i32
    %c0_i32_2 = arith.constant 0 : i32
    return %c0_i32, %c0_i32_0, %c0_i32_1 : i32, i32, i32
  }
  func.func @transform_5(%arg0: i32) -> (i32, i32) {
    %c0_i32 = arith.constant 0 : i32
    %c0_i32_0 = arith.constant 0 : i32
    return %arg0, %c0_i32 : i32, i32
  }
}

</mosaic_0001>

<bundles_post_ra>
// kernel: tpu_custom_call.1
= control target key start
LH: loop header
LB: loop body
LE: loop exit
PB: predicated region body
PF: predicated region fallthrough
CT: control target
= control target key end

     0   :  { %10 = vsyncpa [#allocation3], 0  ;;  %s1407_s18 = smov 0   ;;  %s1533_s0 = inlined_call_operand.vmem [shape: bf16[112,20], index: 0, kind: input, shape index: {}]   ;;  %s1534_s1 = inlined_call_operand.vmem [shape: bf16[20,128], index: 1, kind: input, shape index: {}]   ;;  %s1535_s2 = inlined_call_operand.hbm [shape: bf16[5,128,128], index: 2, kind: input, shape index: {}]   ;;  %s1536_s3 = inlined_call_operand.vmem [shape: f32[1,128], index: 3, kind: input, shape index: {}]   ;;  %s1537_s4 = inlined_call_operand.vmem [shape: f32[7,1,128], index: 4, kind: input, shape index: {}]   ;;  %s1538_s5 = inlined_call_operand.vmem [shape: f32[112,1], index: 5, kind: output, shape index: {}]  }
   0x1 LB: > { %s1021_s19 = sadd.s32 4294967295, %s1370_s18   ;;  %p1023_p0 = scmp.ge.s32.totalorder %s1370_s18, 1  ;;  %s1370_s18 = sphi %s1407_s18, %s16_s18  }
   0x2   : > { %p157_p1 = scmp.lt.s32.totalorder %s1370_s18, 8  ;;  %s1372_s20 = smov [#allocation2]  }
   0x3   : > { %s172_s21 = sshll.u32 %s1372_s20, 4  ;;  %p1419_p3 = scmp.eq.s32.totalorder %s1021_s19, 0  ;;  %s173_s21 = int_to_ptr.vmem [resolvable:$true] %s172_s21 }
   0x4   : > { %p1415_p2 = pnand %p1023_p0, %p157_p1  ;;  %s1345_s24 = scalar_lea.vmem %s173_s21, 5120 }
   0x5   : > { %p1346_p7 = scmp.ne.s32.totalorder %s173_s21, %s1345_s24  ;;  %p1353_p10 = scmp.lt.s32.totalorder %s173_s21, %s173_s21 }
   0x6   : > { %p1256_p4 = pneg %p1415_p2  ;;  %p1354_p11 = scmp.lt.s32.totalorder %s1345_s24, %s1345_s24 }
   0x8   : > { %p1257_p5 = pnand %p1419_p3, %p1256_p4  ;;  %p1355_p12 = por %p1354_p11, %p1353_p10 }
   0xa   : > { %p1336_p6 = pneg %p1257_p5 }
   0xc   : > { %p1348_p8 = pnand %p1346_p7, %p1336_p6 }
   0xe   : > { %p1349_p9 = pneg %p1348_p8 }
  0x10   : > { %p1356_p13 = pnand %p1355_p12, %p1349_p9 }
  0x12   : > { %1359 = shalt.err (!%p1356_p13)
}
  0x13   : > { %s1373_s25 = smov 64   ;;  %s1374_s26 = smov 4  }
  0x14   : > { %1259 = dma.hbm_to_vmem [thread:$0]  (!%p1257_p5), %s1535_s2, 5120, %s173_s21, [#allocation3], %s1373_s25, %s1373_s25, %s1374_s26  }
  0x15   : > { %203 = sbr.rel (%p1415_p2) target bundleno = 1458 (0x5b2), region = 40 }
  0x1a   : > { %1365 = dma.done.wait (%p1419_p3), [#allocation3], 5120  }
  0x1b   : > { %1367 = vsyncadd (%p1419_p3), [#allocation3], 4294962176  ;;  %s1028_s29 = sshll.u32 %s1021_s19, 1  ;;  %v1375_v0 = vmov 0.0   ;;  %vm1376_vm0 = vmmov 0   ;;  %vm274_vm1 = vcmask 1041408  }
  0x1c   : > { %1144 = vmatprep.subr.bf16.mxu0 %v1375_v0  ;;  %1148 = vmatprep.mubr.msk.bf16.mxu0 %vm1376_vm0, %v1375_v0  ;;  %p232_p0 = scmp.lt.s32.totalorder %s1028_s29, 13  ;;  %v1275_v1 = vld [vmem:[%s1534_s1 + $0x8] ss:$0 sps:$4 sm:$0x33]   ;;  %v1276_v3 = vld [vmem:[%s1534_s1] sm:$0xff]   ;;  %v1278_v4 = vld [vmem:[#allocation2 + $0x38] sm:$0xff]  }
  0x1d   : > { %1152 = vmatprep.subr.bf16.mxu1 %v1375_v0  ;;  %1168 = vmatprep.mubr.msk.bf16.mxu1 %vm1376_vm0, %v1375_v0  ;;  %v276_v2 = vsel %vm274_vm1, %v1275_v1, 0  ;;  %v1279_v5 = vld [vmem:[#allocation2 + $0x30] sm:$0xff]   ;;  %vm270_vm2 = vcmask 162816   ;;  %v1280_v7 = vld [vmem:[#allocation2 + $0x28] sm:$0xff]   ;;  %v1281_v8 = vld [vmem:[#allocation2 + $0x20] sm:$0xff]   ;;  %vm950_vm3 = vcmask 7168  }
  0x1e   : > { %s1542_s29 = smov (!%p232_p0, %s1028_s29), 13  ;;  %1145 = vmatpush3.bf16.msra.mxu0 %v276_v2  ;;  %1153 = vmatpush3.bf16.msra.mxu1 %v1278_v4  ;;  %v1282_v9 = vld [vmem:[#allocation2 + $0x18] sm:$0xff]   ;;  %v1283_v10 = vld [vmem:[#allocation2 + $0x10] sm:$0xff]   ;;  %v1284_v11 = vld [vmem:[#allocation2 + $0x8] sm:$0xff]  }
  0x1f   : > { %s1029_s30 = sshll.u32 %s1542_s29, 2  ;;  %1146 = vmatprep.subr.bf16.mxu0 %v1375_v0  ;;  %1154 = vmatprep.subr.bf16.mxu1 %v1375_v0  ;;  %v1285_v12 = vld [vmem:[#allocation2] sm:$0xff]   ;;  %v1286_v13 = vld [vmem:[#allocation2 + $0x78] sm:$0xff]   ;;  %v1287_v14 = vld [vmem:[#allocation2 + $0x70] sm:$0xff]   ;;  %s1031_s6 = sshll.u32 %s1542_s29, 3 }
  0x20   : > { %s235_s10 = scalar_lea.vmem %s1533_s0, %s1029_s30  ;;  %v1288_v15 = vld [vmem:[#allocation2 + $0x68] sm:$0xff]   ;;  %v1289_v16 = vld [vmem:[#allocation2 + $0x60] sm:$0xff]   ;;  %v1290_v17 = vld [vmem:[#allocation2 + $0x58] sm:$0xff]   ;;  %s241_s9 = scalar_lea.vmem %s1538_s5, %s1031_s6 }
  0x21   : > { %v1277_v6 = vld [vmem:[%s235_s10] sm:$0xff]   ;;  %v1291_v28 = vld [vmem:[#allocation2 + $0x50] sm:$0xff]   ;;  %v1292_v29 = vld [vmem:[#allocation2 + $0x48] sm:$0xff]  }
  0x22   : > { %1147 = vmatpush3.bf16.msra.mxu0 %v1276_v3  ;;  %1155 = vmatpush3.bf16.msra.mxu1 %v1279_v5  ;;  %v1032_v18 = vld [vmem:[%s1537_s4] ss:$0 sm:$0xff]  ;;  %v1294_v31 = vld [vmem:[#allocation2 + $0xb8] sm:$0xff]   ;;  %v1295_v32 = vld [vmem:[#allocation2 + $0xb0] sm:$0xff]  }
  0x23   : > { %1172 = vmatprep.subr.bf16.mxu0 %v1375_v0  ;;  %1156 = vmatprep.subr.bf16.mxu1 %v1375_v0  ;;  %v1293_v30 = vld [vmem:[#allocation2 + $0x40] sm:$0xff]   ;;  %v1296_v33 = vld [vmem:[#allocation2 + $0xa8] sm:$0xff]   ;;  %v1298_v35 = vld [vmem:[#allocation2 + $0x98] sm:$0xff]  }
  0x24   : > { %v1297_v34 = vld [vmem:[#allocation2 + $0xa0] sm:$0xff]   ;;  %v1299_v46 = vld [vmem:[#allocation2 + $0x90] sm:$0xff]   ;;  %v1300_v47 = vld [vmem:[#allocation2 + $0x88] sm:$0xff]  }
  0x25   : > { %1149 = vmatmul.mubr.msk.bf16.vlgmr.msra.gmra.mxu0 %vm270_vm2, %v1277_v6  ;;  %v1038_v36 = vld [vmem:[%s1537_s4 + $0x1] ss:$0 sm:$0xff]  ;;  %v1048_v49 = vld [vmem:[%s1537_s4 + $0x2] ss:$0 sm:$0xff]  ;;  %v1302_v59 = vld [vmem:[#allocation2 + $0xf8] sm:$0xff]  }
  0x26   : > { %1188 = vmatprep.mubr.msk.bf16.mxu0 %vm1376_vm0, %v1375_v0  ;;  %1157 = vmatpush3.bf16.msra.mxu1 %v1280_v7  ;;  %v1301_v48 = vld [vmem:[#allocation2 + $0x80] sm:$0xff]   ;;  %v1303_v60 = vld [vmem:[#allocation2 + $0xf0] sm:$0xff]   ;;  %v1304_v61 = vld [vmem:[#allocation2 + $0xe8] sm:$0xff]  }
  0x27   : > { %1158 = vmatprep.subr.bf16.mxu1 %v1375_v0  ;;  %1173 = vmatpush3.bf16.msra.mxu0 %v1286_v13  ;;  %v1305_v62 = vld [vmem:[#allocation2 + $0xe0] sm:$0xff]   ;;  %v1306_v63 = vld [vmem:[#allocation2 + $0xd8] sm:$0xff]   ;;  %v1307_v1 = vld [vmem:[#allocation2 + $0xd0] sm:$0xff]  }
  0x28   : > { %1174 = vmatprep.subr.bf16.mxu0 %v1375_v0  ;;  %v1308_v2 = vld [vmem:[#allocation2 + $0xc8] sm:$0xff]   ;;  %v1309_v3 = vld [vmem:[#allocation2 + $0xc0] sm:$0xff]   ;;  %v1310_v4 = vld [vmem:[#allocation2 + $0x138] sm:$0xff]  }
  0x29   : > { %v1311_v5 = vld [vmem:[#allocation2 + $0x130] sm:$0xff]   ;;  %v1312_v6 = vld [vmem:[#allocation2 + $0x128] sm:$0xff]   ;;  %v1313_v7 = vld [vmem:[#allocation2 + $0x120] sm:$0xff]  }
  0x2a   : > { %1159 = vmatpush3.bf16.msra.mxu1 %v1281_v8  ;;  %v1314_v8 = vld [vmem:[#allocation2 + $0x118] sm:$0xff]  }
  0x2b   : > { %1160 = vmatprep.subr.bf16.mxu1 %v1375_v0  ;;  %1175 = vmatpush3.bf16.msra.mxu0 %v1287_v14 }
  0x2c   : > { %1176 = vmatprep.subr.bf16.mxu0 %v1375_v0 }
  0x2e   : > { %1161 = vmatpush3.bf16.msra.mxu1 %v1282_v9  ;;  %v1058_v9 = vld [vmem:[%s1537_s4 + $0x3] ss:$0 sm:$0xff] }
  0x2f   : > { %1162 = vmatprep.subr.bf16.mxu1 %v1375_v0  ;;  %1177 = vmatpush3.bf16.msra.mxu0 %v1288_v15 }
  0x30   : > { %1178 = vmatprep.subr.bf16.mxu0 %v1375_v0 }
  0x32   : > { %1163 = vmatpush3.bf16.msra.mxu1 %v1283_v10 }
  0x33   : > { %1164 = vmatprep.subr.bf16.mxu1 %v1375_v0  ;;  %1179 = vmatpush3.bf16.msra.mxu0 %v1289_v16 }
  0x34   : > { %1180 = vmatprep.subr.bf16.mxu0 %v1375_v0 }
  0x36   : > { %1165 = vmatpush3.bf16.msra.mxu1 %v1284_v11 }
  0x37   : > { %1166 = vmatprep.subr.bf16.mxu1 %v1375_v0  ;;  %1181 = vmatpush3.bf16.msra.mxu0 %v1290_v17 }
  0x38   : > { %1182 = vmatprep.subr.bf16.mxu0 %v1375_v0 }
  0x3a   : > { %1167 = vmatpush3.bf16.msra.mxu1 %v1285_v12 }
  0x3b   : > { %1192 = vmatprep.subr.bf16.mxu1 %v1375_v0  ;;  %1183 = vmatpush3.bf16.msra.mxu0 %v1291_v28  ;;  %v1070_v28 = vld [vmem:[%s1537_s4 + $0x4] ss:$0 sm:$0xff] }
  0x3c   : > { %1184 = vmatprep.subr.bf16.mxu0 %v1375_v0 }
  0x3f   : > { %1185 = vmatpush3.bf16.msra.mxu0 %v1292_v29 }
  0x40   : > { %1186 = vmatprep.subr.bf16.mxu0 %v1375_v0 }
  0x43   : > { %1187 = vmatpush3.bf16.msra.mxu0 %v1293_v30 }
  0x44   : > { %1212 = vmatprep.subr.bf16.mxu0 %v1375_v0 }
  0xe5   : > { %v312_v19 = vpop.f32.mrf.mxu0 }
  0xe6   : > { %v313_v21 = vadd.f32 %v1032_v18, %v312_v19 }
  0xe7   : > { %v1150_v20 = vpop.f32.mrf.mxu0 }
  0xe8   : > { %v319_v25 = vmax.f32 %v313_v21, 0.0 }
  0xe9   : > { %v315_v22 = vpop.f32.mrf.mxu0 }
  0xea   : > { %v316_v23 = vadd.f32 %v1032_v18, %v315_v22 }
  0xeb   : > { %v1151_v24 = vpop.f32.mrf.mxu0 }
  0xec   : > { %v320_v26 = vmax.f32 %v316_v23, 0.0 }
  0xee   : > { %v321_v27 = vpack.c.bf16 %v320_v26, %v319_v25  ;;  %v1315_v25 = vld [vmem:[#allocation2 + $0x110] sm:$0xff]   ;;  %v1316_v26 = vld [vmem:[#allocation2 + $0x108] sm:$0xff]  }
  0xf0   : > { %1169 = vmatmul.mubr.bf16.vlgmr.msra.gmra.mxu1 %v321_v27  ;;  %v1317_v27 = vld [vmem:[#allocation2 + $0x100] sm:$0xff]  }
  0xf1   : > { %1208 = vmatprep.mubr.msk.bf16.mxu1 %vm1376_vm0, %v1375_v0  ;;  %1193 = vmatpush3.bf16.msra.mxu1 %v1294_v31 }
  0xf2   : > { %1194 = vmatprep.subr.bf16.mxu1 %v1375_v0 }
  0xf5   : > { %1195 = vmatpush3.bf16.msra.mxu1 %v1295_v32 }
  0xf6   : > { %1196 = vmatprep.subr.bf16.mxu1 %v1375_v0 }
  0xf9   : > { %1197 = vmatpush3.bf16.msra.mxu1 %v1296_v33 }
  0xfa   : > { %1198 = vmatprep.subr.bf16.mxu1 %v1375_v0 }
  0xfd   : > { %1199 = vmatpush3.bf16.msra.mxu1 %v1297_v34 }
  0xfe   : > { %1200 = vmatprep.subr.bf16.mxu1 %v1375_v0 }
 0x101   : > { %1201 = vmatpush3.bf16.msra.mxu1 %v1298_v35 }
 0x102   : > { %1202 = vmatprep.subr.bf16.mxu1 %v1375_v0 }
 0x105   : > { %1203 = vmatpush3.bf16.msra.mxu1 %v1299_v46 }
 0x106   : > { %1204 = vmatprep.subr.bf16.mxu1 %v1375_v0 }
 0x109   : > { %1205 = vmatpush3.bf16.msra.mxu1 %v1300_v47 }
 0x10a   : > { %1206 = vmatprep.subr.bf16.mxu1 %v1375_v0 }
 0x10d   : > { %1207 = vmatpush3.bf16.msra.mxu1 %v1301_v48 }
 0x10e   : > { %1232 = vmatprep.subr.bf16.mxu1 %v1375_v0 }
 0x1b0   : > { %v428_v37 = vpop.f32.mrf.mxu1 }
 0x1b1   : > { %v429_v39 = vadd.f32 %v1038_v36, %v428_v37 }
 0x1b2   : > { %v1170_v38 = vpop.f32.mrf.mxu1 }
 0x1b3   : > { %v435_v43 = vmax.f32 %v429_v39, 0.0 }
 0x1b4   : > { %v431_v40 = vpop.f32.mrf.mxu1 }
 0x1b5   : > { %v432_v41 = vadd.f32 %v1038_v36, %v431_v40 }
 0x1b6   : > { %v1171_v42 = vpop.f32.mrf.mxu1 }
 0x1b7   : > { %v436_v44 = vmax.f32 %v432_v41, 0.0  ;;  %v1089_v41 = vld [vmem:[%s1536_s3] ss:$0 sm:$0xff] }
 0x1b9   : > { %v437_v45 = vpack.c.bf16 %v436_v44, %v435_v43 }
 0x1bb   : > { %1189 = vmatmul.mubr.bf16.vlgmr.msra.gmra.mxu0 %v437_v45 }
 0x1bc   : > { %1228 = vmatprep.mubr.msk.bf16.mxu0 %vm1376_vm0, %v1375_v0  ;;  %1213 = vmatpush3.bf16.msra.mxu0 %v1302_v59 }
 0x1bd   : > { %1214 = vmatprep.subr.bf16.mxu0 %v1375_v0 }
 0x1c0   : > { %1215 = vmatpush3.bf16.msra.mxu0 %v1303_v60 }
 0x1c1   : > { %1216 = vmatprep.subr.bf16.mxu0 %v1375_v0 }
 0x1c4   : > { %1217 = vmatpush3.bf16.msra.mxu0 %v1304_v61 }
 0x1c5   : > { %1218 = vmatprep.subr.bf16.mxu0 %v1375_v0 }
 0x1c8   : > { %1219 = vmatpush3.bf16.msra.mxu0 %v1305_v62 }
 0x1c9   : > { %1220 = vmatprep.subr.bf16.mxu0 %v1375_v0 }
 0x1cc   : > { %1221 = vmatpush3.bf16.msra.mxu0 %v1306_v63 }
 0x1cd   : > { %1222 = vmatprep.subr.bf16.mxu0 %v1375_v0 }
 0x1d0   : > { %1223 = vmatpush3.bf16.msra.mxu0 %v1307_v1 }
 0x1d1   : > { %1224 = vmatprep.subr.bf16.mxu0 %v1375_v0 }
 0x1d4   : > { %1225 = vmatpush3.bf16.msra.mxu0 %v1308_v2 }
 0x1d5   : > { %1226 = vmatprep.subr.bf16.mxu0 %v1375_v0 }
 0x1d8   : > { %1227 = vmatpush3.bf16.msra.mxu0 %v1309_v3 }
 0x27b   : > { %v545_v50 = vpop.f32.mrf.mxu0 }
 0x27c   : > { %v546_v52 = vadd.f32 %v1048_v49, %v545_v50 }
 0x27d   : > { %v1190_v51 = vpop.f32.mrf.mxu0 }
 0x27e   : > { %v552_v56 = vmax.f32 %v546_v52, 0.0 }
 0x27f   : > { %v548_v53 = vpop.f32.mrf.mxu0 }
 0x280   : > { %v549_v54 = vadd.f32 %v1048_v49, %v548_v53  ;;  %v1091_v49 = vld [vmem:[%s1537_s4 + $0x6] ss:$0 sm:$0xff] }
 0x281   : > { %v1191_v55 = vpop.f32.mrf.mxu0 }
 0x282   : > { %v553_v57 = vmax.f32 %v549_v54, 0.0 }
 0x284   : > { %v554_v58 = vpack.c.bf16 %v553_v57, %v552_v56 }
 0x286   : > { %1209 = vmatmul.mubr.bf16.vlgmr.msra.gmra.mxu1 %v554_v58 }
 0x287   : > { %1248 = vmatprep.mubr.msk.bf16.mxu1 %vm1376_vm0, %v1375_v0  ;;  %1233 = vmatpush3.bf16.msra.mxu1 %v1310_v4 }
 0x288   : > { %1234 = vmatprep.subr.bf16.mxu1 %v1375_v0 }
 0x28b   : > { %1235 = vmatpush3.bf16.msra.mxu1 %v1311_v5 }
 0x28c   : > { %1236 = vmatprep.subr.bf16.mxu1 %v1375_v0 }
 0x28f   : > { %1237 = vmatpush3.bf16.msra.mxu1 %v1312_v6 }
 0x290   : > { %1238 = vmatprep.subr.bf16.mxu1 %v1375_v0 }
 0x293   : > { %1239 = vmatpush3.bf16.msra.mxu1 %v1313_v7 }
 0x294   : > { %1240 = vmatprep.subr.bf16.mxu1 %v1375_v0 }
 0x297   : > { %1241 = vmatpush3.bf16.msra.mxu1 %v1314_v8 }
 0x298   : > { %1242 = vmatprep.subr.bf16.mxu1 %v1375_v0 }
 0x29b   : > { %1243 = vmatpush3.bf16.msra.mxu1 %v1315_v25 }
 0x29c   : > { %1244 = vmatprep.subr.bf16.mxu1 %v1375_v0 }
 0x29f   : > { %1245 = vmatpush3.bf16.msra.mxu1 %v1316_v26 }
 0x2a0   : > { %1246 = vmatprep.subr.bf16.mxu1 %v1375_v0  ;;  %v1080_v0 = vld [vmem:[%s1537_s4 + $0x5] ss:$0 sm:$0xff] }
 0x2a3   : > { %1247 = vmatpush3.bf16.msra.mxu1 %v1317_v27 }
 0x346   : > { %v662_v10 = vpop.f32.mrf.mxu1 }
 0x347   : > { %v663_v11 = vadd.f32 %v1058_v9, %v662_v10 }
 0x348   : > { %v1210_v12 = vpop.f32.mrf.mxu1 }
 0x349   : > { %v1067_v13 = vmul.f32 -1.442695, %v663_v11 }
 0x34a   : > { %v665_v14 = vpop.f32.mrf.mxu1 }
 0x34b   : > { %1318 = vpow2.f32 %v1067_v13  ;;  %v666_v15 = vadd.f32 %v1058_v9, %v665_v14 }
 0x34c   : > { %v1211_v16 = vpop.f32.mrf.mxu1 }
 0x34d   : > { %v1068_v17 = vmul.f32 -1.442695, %v666_v15 }
 0x34f   : > { %1320 = vpow2.f32 %v1068_v17 }
 0x358   : > { %v1319_v18 = vpop.eup %1318 }
 0x359   : > { %v675_v19 = vadd.f32 1.0, %v1319_v18 }
 0x35b   : > { %1322 = vrcp.f32 %v675_v19 }
 0x35c   : > { %v1321_v20 = vpop.eup %1320 }
 0x35d   : > { %v676_v21 = vadd.f32 1.0, %v1321_v20 }
 0x35f   : > { %1324 = vrcp.f32 %v676_v21 }
 0x368   : > { %v1323_v22 = vpop.eup %1322 }
 0x36c   : > { %v1325_v23 = vpop.eup %1324 }
 0x36d   : > { %v681_v24 = vpack.c.bf16 %v1325_v23, %v1323_v22 }
 0x36f   : > { %1229 = vmatmul.mubr.bf16.vlgmr.msra.gmra.mxu0 %v681_v24 }
 0x42f   : > { %v789_v29 = vpop.f32.mrf.mxu0 }
 0x430   : > { %v790_v31 = vadd.f32 %v1070_v28, %v789_v29 }
 0x431   : > { %v1230_v30 = vpop.f32.mrf.mxu0 }
 0x432   : > { %v796_v35 = vmax.f32 %v790_v31, 0.0 }
 0x433   : > { %v792_v32 = vpop.f32.mrf.mxu0 }
 0x434   : > { %v793_v33 = vadd.f32 %v1070_v28, %v792_v32 }
 0x435   : > { %v1231_v34 = vpop.f32.mrf.mxu0 }
 0x436   : > { %v797_v36 = vmax.f32 %v793_v33, 0.0 }
 0x438   : > { %v798_v37 = vpack.c.bf16 %v797_v36, %v796_v35 }
 0x43a   : > { %1249 = vmatmul.mubr.bf16.vlgmr.msra.gmra.mxu1 %v798_v37 }
 0x4fa   : > { %v906_v38 = vpop.f32.mrf.mxu1 }
 0x4fb   : > { %v907_v39 = vadd.f32 %v1080_v0, %v906_v38 }
 0x4fc   : > { %v1250_v40 = vpop.f32.mrf.mxu1 }
 0x4fd   : > { %v913_v42 = vmax.f32 %v907_v39, 0.0 }
 0x4fe   : > { %v909_v43 = vpop.f32.mrf.mxu1 }
 0x4ff   : > { %v910_v44 = vadd.f32 %v1080_v0, %v909_v43  ;;  %v922_v45 = vmul.f32 %v1089_v41, %v913_v42 }
 0x500   : > { %v1251_v46 = vpop.f32.mrf.mxu1 }
 0x501   : > { %v914_v47 = vmax.f32 %v910_v44, 0.0  ;;  %924 = vadd.xlane.f32.xlu0 %v922_v45 }
 0x503   : > { %v923_v48 = vmul.f32 %v1089_v41, %v914_v47 }
 0x505   : > { %926 = vadd.xlane.f32.xlu0 %v923_v48 }
 0x58a   : > { %v925_v50 = vpop.xlane.xlu0 %924 }
 0x58b   : > { %v936_v51 = vadd.f32 %v1091_v49, %v925_v50 }
 0x58d   : > { %v1092_v52 = vmul.f32 -1.442695, %v936_v51 }
 0x58e   : > { %v927_v53 = vpop.xlane.xlu0 %926 }
 0x58f   : > { %1326 = vpow2.f32 %v1092_v52  ;;  %v937_v54 = vadd.f32 %v1091_v49, %v927_v53 }
 0x591   : > { %v1093_v55 = vmul.f32 -1.442695, %v937_v54 }
 0x593   : > { %1328 = vpow2.f32 %v1093_v55 }
 0x59c   : > { %v1327_v56 = vpop.eup %1326 }
 0x59d   : > { %v944_v57 = vadd.f32 1.0, %v1327_v56 }
 0x59f   : > { %1330 = vrcp.f32 %v944_v57 }
 0x5a0   : > { %v1329_v58 = vpop.eup %1328 }
 0x5a1   : > { %v945_v59 = vadd.f32 1.0, %v1329_v58 }
 0x5a3   : > { %1332 = vrcp.f32 %v945_v59 }
 0x5ac   : > { %v1331_v60 = vpop.eup %1330 }
 0x5ad   : > { %951 = vst.msk [vmem:[%s241_s9] sm:$0xff] %vm950_vm3, %v1331_v60 }
 0x5b0   : > { %v1333_v61 = vpop.eup %1332 }
 0x5b1   : > { %952 = vst.msk [vmem:[%s241_s9 + $0x8] sm:$0xff] %vm950_vm3, %v1333_v61 }
 0x5b2 PF: > { %s16_s18 = sadd.s32 1, %s1370_s18  }
 0x5b3   : > { %p13_p1 = scmp.ge.s32.totalorder %s16_s18, 9  }
 0x5b5   :  { %15 = sbr.rel (!%p13_p1) target bundleno = 1 (0x1), region = 85 }
 0x5ba   :  { %975 = vsyncpa [#allocation3], 1 }
 0x5bb   :  { %977 = vsyncpa [#allocation3 + $0x1], 1 }

</bundles_post_ra>
